<compile_context>
chip_gen: v5e
topology: v5e:2x2
jax: 0.10.0
libtpu: 0.0.40
codegen_flags: <defaults>
</compile_context>

<pallas_src>
import functools

import jax
import jax.numpy as jnp
from jax.experimental import pallas as pl
from jax.experimental.pallas import tpu as pltpu


# --------------------------------------------------------------------------
# Kernels.  Layout: channels on sublanes, spatial (H*W) on lanes.
# --------------------------------------------------------------------------
def _attn_gate_fused_kernel(g_ref, x_ref, wgx_ref, bgx_ref, wp_ref, bp_ref,
                            o_ref, gx_ref, *, f_l):
    """Single-MXU-pass variant: g/x tiles stacked along sublanes in VMEM."""
    # Stack [g; x] -> (F_l + F_g, T): both 1x1 convs become one dot with
    # contraction K = F_l + F_g (halves MXU passes for small channel counts).
    gx_ref[:f_l, :] = g_ref[...]
    gx_ref[f_l:, :] = x_ref[...]

    # a = relu(W_gx @ [g; x] + (b_g + b_x))          (BN folded into W / b)
    a = jnp.dot(wgx_ref[...], gx_ref[...], preferred_element_type=jnp.float32)
    a = jnp.maximum(a + bgx_ref[...], 0.0)                         # (F_int, T) f32

    # psi = sigmoid(w_psi . a + b_psi): width-1 output -> VPU multiply +
    # sublane (XLU) reduction instead of a 1-wide MXU matmul.
    psi = jax.nn.sigmoid(
        jnp.sum(a * wp_ref[...], axis=0, keepdims=True) + bp_ref[...])  # (1, T)

    # out = x * psi (sublane broadcast), multiplied in the native dtype so the
    # big x tile never lives as an f32 copy.
    xv = x_ref[...]
    o_ref[...] = (xv * psi.astype(xv.dtype)).astype(o_ref.dtype)


def _attn_gate_kernel(g_ref, x_ref, wg_ref, wx_ref, bgx_ref, wp_ref, bp_ref,
                      o_ref):
    """Two-dot fallback when F_l is not sublane-aligned for the stacked copy."""
    a = (jnp.dot(wg_ref[...], g_ref[...], preferred_element_type=jnp.float32)
         + jnp.dot(wx_ref[...], x_ref[...], preferred_element_type=jnp.float32))
    a = jnp.maximum(a + bgx_ref[...], 0.0)
    psi = jax.nn.sigmoid(
        jnp.sum(a * wp_ref[...], axis=0, keepdims=True) + bp_ref[...])
    xv = x_ref[...]
    o_ref[...] = (xv * psi.astype(xv.dtype)).astype(o_ref.dtype)


# --------------------------------------------------------------------------
# Tile sizing from a per-chip VMEM budget.
# --------------------------------------------------------------------------
def _vmem_capacity_bytes():
    try:
        info = pltpu.get_tpu_info()
        cap = getattr(info, "vmem_capacity_bytes", None)
        if cap:
            return int(cap)
    except Exception:
        pass
    return 64 * 1024 * 1024            # conservative fallback (v7x-sized VMEM)


def _pick_spatial_tile(HW, N, F_l, F_g, F_int, in_bytes, fuse, vmem_cap):
    """Largest 128-multiple lane tile that fits a double-buffered VMEM budget."""
    if HW < 128:
        return HW                                      # full-extent block is legal
    per_lane = 2 * (F_l + 2 * F_g) * in_bytes          # double-buffered g, x, out
    if fuse:
        per_lane += (F_l + F_g) * in_bytes             # stacked [g; x] scratch
    per_lane += 3 * F_int * 4 + 16                     # f32 intermediates (a, psi)
    budget = vmem_cap // 2                             # headroom: weights + compiler
    t = max(128, min(budget // per_lane, 8192) // 128 * 128)
    t = min(t, HW // 128 * 128)
    # Keep the grid >= 2 steps when N == 1 so both v7x TensorCores get work
    # (harmless on the single-core v5e/v6e).
    if N == 1 and HW >= 256:
        t = min(t, max(128, HW // 2 // 128 * 128))
    return t


# --------------------------------------------------------------------------
# Wrapper: NCHW -> (N, C, HW) view, pallas_call, reshape back.  No pad/slice.
# --------------------------------------------------------------------------
def attention_block(g, x, params):
    """out = x * sigmoid(psi_conv(relu(W_g(g) + W_x(x)))), eval-mode BN folded.

    Matches the module as written: W_g is Conv2d(F_l -> F_int) applied to g,
    W_x is Conv2d(F_g -> F_int) applied to x.
    """
    wg, bg, wx, bx, wp, bp = params
    N, F_l, H, W = g.shape
    Nx, F_g, Hx, Wx = x.shape
    assert (N, H, W) == (Nx, Hx, Wx), "g and x must share batch/spatial dims"
    F_int = wg.shape[0]
    HW = H * W
    in_dtype = x.dtype
    in_bytes = x.dtype.itemsize

    # Fuse the two 1x1 convs into one MXU pass when the stacked [g; x] copy is
    # sublane-aligned for this dtype; otherwise fall back to two dots.
    align = {4: 8, 2: 16, 1: 32}.get(in_bytes, 8)
    fuse = (F_l % align == 0)

    vmem_cap = _vmem_capacity_bytes()
    t_hw = _pick_spatial_tile(HW, N, F_l, F_g, F_int, in_bytes, fuse, vmem_cap)
    # Ragged last tile is handled by Pallas partial-block masking (reads padded
    # with garbage, OOB writes dropped).  Every op in the kernel is lane-local,
    # so garbage lanes never contaminate valid output lanes.
    n_spatial = pl.cdiv(HW, t_hw)

    g3 = g.reshape(N, F_l, HW)         # free views, no HBM traffic
    x3 = x.reshape(N, F_g, HW)

    # Tiny weight prep (negligible): pre-summed bias, f32 psi weight column.
    bgx = (bg + bx).astype(jnp.float32)[:, None]          # (F_int, 1)
    wp_col = wp.astype(jnp.float32)[:, None]              # (F_int, 1)
    bp_11 = bp.astype(jnp.float32).reshape(1, 1)          # (1, 1)

    def data_spec(C):
        return pl.BlockSpec((None, C, t_hw), lambda n, s: (n, 0, s))

    def full_spec(shape):
        return pl.BlockSpec(shape, lambda n, s: (0, 0))

    if fuse:
        wgx = jnp.concatenate([wg, wx], axis=1).astype(in_dtype)  # (F_int, F_l+F_g)
        kernel = functools.partial(_attn_gate_fused_kernel, f_l=F_l)
        in_specs = [data_spec(F_l), data_spec(F_g),
                    full_spec((F_int, F_l + F_g)), full_spec((F_int, 1)),
                    full_spec((F_int, 1)), full_spec((1, 1))]
        operands = (g3, x3, wgx, bgx, wp_col, bp_11)
        scratch = [pltpu.VMEM((F_l + F_g, t_hw), in_dtype)]
    else:
        kernel = _attn_gate_kernel
        in_specs = [data_spec(F_l), data_spec(F_g),
                    full_spec((F_int, F_l)), full_spec((F_int, F_g)),
                    full_spec((F_int, 1)), full_spec((F_int, 1)),
                    full_spec((1, 1))]
        operands = (g3, x3, wg.astype(in_dtype), wx.astype(in_dtype),
                    bgx, wp_col, bp_11)
        scratch = []

    cost = pl.CostEstimate(
        flops=int(N * HW * (2 * F_int * (F_l + F_g) + 4 * F_int + 4)),
        transcendentals=int(N * HW),
        bytes_accessed=int(N * HW * (F_l + 2 * F_g) * in_bytes))

    out = pl.pallas_call(
        kernel,
        out_shape=jax.ShapeDtypeStruct((N, F_g, HW), in_dtype),
        grid_spec=pltpu.PrefetchScalarGridSpec(
            num_scalar_prefetch=0,
            grid=(N, n_spatial),
            in_specs=in_specs,
            out_specs=pl.BlockSpec((None, F_g, t_hw), lambda n, s: (n, 0, s)),
            scratch_shapes=scratch),
        compiler_params=pltpu.CompilerParams(
            dimension_semantics=("parallel", "parallel"),
            vmem_limit_bytes=int(vmem_cap * 3 // 4)),
        cost_estimate=cost,
    )(*operands)

    return out.reshape(N, F_g, H, W)


# --------------------------------------------------------------------------
# Deterministic parameters + eval-mode BatchNorm folding.
# --------------------------------------------------------------------------
def _fold_conv_bn(w, b, gamma, beta, mean, var, eps=1e-5):
    """Fold eval-mode BN into a 1x1 conv.  w: (Cout, Cin), b: (Cout,)."""
    scale = gamma / jnp.sqrt(var + eps)
    return w * scale[:, None], scale * (b - mean) + beta


def init_params(key, F_g, F_l, F_int):
    ks = jax.random.split(key, 18)

    def conv(kw, kb, cin, cout):
        w = jax.random.normal(kw, (cout, cin), jnp.float32) * 0.2
        b = jax.random.normal(kb, (cout,), jnp.float32) * 0.1
        return w, b

    def bn(k0, k1, k2, k3, c):
        gamma = 1.0 + 0.1 * jax.random.normal(k0, (c,), jnp.float32)
        beta = 0.1 * jax.random.normal(k1, (c,), jnp.float32)
        mean = 0.1 * jax.random.normal(k2, (c,), jnp.float32)
        var = 1.0 + 0.1 * jax.random.uniform(k3, (c,), jnp.float32)
        return gamma, beta, mean, var

    # W_g: Conv2d(F_l -> F_int) + BN;  W_x: Conv2d(F_g -> F_int) + BN;
    # psi: Conv2d(F_int -> 1) + BN + Sigmoid.   (Naming follows the module.)
    wg, bg = _fold_conv_bn(*conv(ks[0], ks[1], F_l, F_int),
                           *bn(ks[2], ks[3], ks[4], ks[5], F_int))
    wx, bx = _fold_conv_bn(*conv(ks[6], ks[7], F_g, F_int),
                           *bn(ks[8], ks[9], ks[10], ks[11], F_int))
    wp, bp = _fold_conv_bn(*conv(ks[12], ks[13], F_int, 1),
                           *bn(ks[14], ks[15], ks[16], ks[17], 1))
    return (wg, bg, wx, bx, wp[0], bp)   # wp[0]: (F_int,), bp: (1,)


# --------------------------------------------------------------------------
# Pure-JAX reference (same eval-mode semantics), high-precision einsums.
# --------------------------------------------------------------------------
def reference(g, x, params):
    wg, bg, wx, bx, wp, bp = params
    N, F_l, H, W = g.shape
    _, F_g, _, _ = x.shape
    hp = jax.lax.Precision.HIGHEST
    g3 = g.reshape(N, F_l, -1).astype(jnp.float32)
    x3 = x.reshape(N, F_g, -1).astype(jnp.float32)
    g1 = jnp.einsum('oc,ncs->nos', wg, g3, precision=hp) + bg[None, :, None]
    x1 = jnp.einsum('oc,ncs->nos', wx, x3, precision=hp) + bx[None, :, None]
    a = jnp.maximum(g1 + x1, 0.0)
    psi = jax.nn.sigmoid(
        jnp.einsum('c,ncs->ns', wp, a, precision=hp)[:, None, :] + bp[0])
    out = x3 * psi
    return out.reshape(N, F_g, H, W).astype(x.dtype)


if __name__ == "__main__":
    def run_case(name, *, N, F_g, F_l, F_int, H, W, dtype, tol, key):
        kg, kx, kp = jax.random.split(key, 3)
        g = jax.random.normal(kg, (N, F_l, H, W), jnp.float32).astype(dtype)
        x = jax.random.normal(kx, (N, F_g, H, W), jnp.float32).astype(dtype)
        params = init_params(kp, F_g, F_l, F_int)
        out = jax.block_until_ready(attention_block(g, x, params))
        ref = reference(g, x, params)
        assert out.shape == (N, F_g, H, W) and out.dtype == dtype
        err = float(jnp.max(jnp.abs(out.astype(jnp.float32)
                                    - ref.astype(jnp.float32))))
        assert err < tol, f"{name}: max abs err {err} >= {tol}"

    k1, k2, k3 = jax.random.split(jax.random.PRNGKey(0), 3)
    # Fused single-MXU-pass path, f32, batch=2, 16x16 spatial.
    run_case("fused_f32", N=2, F_g=8, F_l=8, F_int=8, H=16, W=16,
             dtype=jnp.float32, tol=5e-3, key=k1)
    # Two-dot path, F_g != F_l, ragged last spatial tile (HW=144 not % 128).
    run_case("ragged_f32", N=1, F_g=6, F_l=4, F_int=8, H=12, W=12,
             dtype=jnp.float32, tol=5e-3, key=k2)
    # bf16 inputs exercise the native-dtype (peak) MXU path.
    run_case("fused_bf16", N=2, F_g=16, F_l=16, F_int=8, H=16, W=16,
             dtype=jnp.bfloat16, tol=4e-2, key=k3)
    print("KERNEL_OK")
</pallas_src>

<mosaic_0001>
module attributes {stable_mosaic.version = 11 : i64} {
  func.func @_attn_gate_fused_kernel(%arg0: i32, %arg1: i32, %arg2: memref<1x8x256xf32, #tpu.memory_space<vmem>>, %arg3: memref<1x8x256xf32, #tpu.memory_space<vmem>>, %arg4: memref<8x16xf32, #tpu.memory_space<vmem>>, %arg5: memref<8x1xf32, #tpu.memory_space<vmem>>, %arg6: memref<8x1xf32, #tpu.memory_space<vmem>>, %arg7: memref<1x1xf32, #tpu.memory_space<vmem>>, %arg8: memref<1x8x256xf32, #tpu.memory_space<vmem>>, %arg9: memref<16x256xf32, #tpu.memory_space<vmem>>) attributes {dimension_semantics = [#tpu.dimension_semantics<parallel>, #tpu.dimension_semantics<parallel>], iteration_bounds = array<i64: 2, 1>, scalar_prefetch = 0 : i64, scratch_operands = 1 : i64, tpu.core_type = #tpu.core_type<tc>, window_params = [{transform_indices = @transform_0, window_bounds = array<i64: 1, 8, 256>}, {transform_indices = @transform_1, window_bounds = array<i64: 1, 8, 256>}, {pipeline_mode = #tpu.pipeline_mode<synchronous>, transform_indices = @transform_2, window_bounds = array<i64: 8, 16>}, {pipeline_mode = #tpu.pipeline_mode<synchronous>, transform_indices = @transform_3, window_bounds = array<i64: 8, 1>}, {pipeline_mode = #tpu.pipeline_mode<synchronous>, transform_indices = @transform_4, window_bounds = array<i64: 8, 1>}, {pipeline_mode = #tpu.pipeline_mode<synchronous>, transform_indices = @transform_5, window_bounds = array<i64: 1, 1>}, {transform_indices = @transform_6, window_bounds = array<i64: 1, 8, 256>}]} {
    %c0 = arith.constant 0 : index
    %c0_0 = arith.constant 0 : index
    %c0_1 = arith.constant 0 : index
    %0 = vector.load %arg2[%c0, %c0_0, %c0_1] : memref<1x8x256xf32, #tpu.memory_space<vmem>>, vector<1x8x256xf32>
    %1 = vector.shape_cast %0 : vector<1x8x256xf32> to vector<8x256xf32>
    %c0_2 = arith.constant 0 : index
    %c0_3 = arith.constant 0 : index
    %2 = vector.load %arg9[%c0_2, %c0_3] : memref<16x256xf32, #tpu.memory_space<vmem>>, vector<8x256xf32>
    tpu.vector_store %arg9[%c0_2, %c0_3], %1 {strides = array<i32>} : memref<16x256xf32, #tpu.memory_space<vmem>>, vector<8x256xf32>,
    %c0_4 = arith.constant 0 : index
    %c0_5 = arith.constant 0 : index
    %c0_6 = arith.constant 0 : index
    %3 = vector.load %arg3[%c0_4, %c0_5, %c0_6] : memref<1x8x256xf32, #tpu.memory_space<vmem>>, vector<1x8x256xf32>
    %4 = vector.shape_cast %3 : vector<1x8x256xf32> to vector<8x256xf32>
    %c8 = arith.constant 8 : index
    %c0_7 = arith.constant 0 : index
    %5 = vector.load %arg9[%c8, %c0_7] : memref<16x256xf32, #tpu.memory_space<vmem>>, vector<8x256xf32>
    tpu.vector_store %arg9[%c8, %c0_7], %4 {strides = array<i32>} : memref<16x256xf32, #tpu.memory_space<vmem>>, vector<8x256xf32>,
    %c0_8 = arith.constant 0 : index
    %c0_9 = arith.constant 0 : index
    %6 = vector.load %arg4[%c0_8, %c0_9] : memref<8x16xf32, #tpu.memory_space<vmem>>, vector<8x16xf32>
    %c0_10 = arith.constant 0 : index
    %c0_11 = arith.constant 0 : index
    %7 = vector.load %arg9[%c0_10, %c0_11] : memref<16x256xf32, #tpu.memory_space<vmem>>, vector<16x256xf32>
    %cst = arith.constant dense<0.000000e+00> : vector<8x256xf32>
    %8 = tpu.matmul %6, %7, %cst {dimension_numbers = #tpu.dot_dimension_numbers<[1], [0], [0], [1], [0, 0, 1, 1], [], []>} : vector<8x16xf32>, vector<16x256xf32>, vector<8x256xf32> -> vector<8x256xf32>
    %c0_12 = arith.constant 0 : index
    %c0_13 = arith.constant 0 : index
    %9 = vector.load %arg5[%c0_12, %c0_13] : memref<8x1xf32, #tpu.memory_space<vmem>>, vector<8x1xf32>
    %10 = vector.broadcast %9 : vector<8x1xf32> to vector<8x256xf32>
    %11 = arith.addf %8, %10 : vector<8x256xf32>
    %cst_14 = arith.constant 0.000000e+00 : f32
    %12 = vector.broadcast %cst_14 : f32 to vector<8x256xf32>
    %13 = arith.maximumf %11, %12 : vector<8x256xf32>
    %c0_15 = arith.constant 0 : index
    %c0_16 = arith.constant 0 : index
    %14 = vector.load %arg6[%c0_15, %c0_16] : memref<8x1xf32, #tpu.memory_space<vmem>>, vector<8x1xf32>
    %15 = vector.broadcast %14 : vector<8x1xf32> to vector<8x256xf32>
    %16 = arith.mulf %13, %15 : vector<8x256xf32>
    %cst_17 = arith.constant dense<0.000000e+00> : vector<256xf32>
    %17 = vector.multi_reduction <add>, %16, %cst_17 [0] : vector<8x256xf32> to vector<256xf32>
    %18 = vector.shape_cast %17 : vector<256xf32> to vector<1x256xf32>
    %c0_18 = arith.constant 0 : index
    %c0_19 = arith.constant 0 : index
    %19 = vector.load %arg7[%c0_18, %c0_19] : memref<1x1xf32, #tpu.memory_space<vmem>>, vector<1x1xf32>
    %20 = vector.broadcast %19 : vector<1x1xf32> to vector<1x256xf32>
    %21 = arith.addf %18, %20 : vector<1x256xf32>
    %22 = arith.negf %21 : vector<1x256xf32>
    %23 = math.exp %22 : vector<1x256xf32>
    %cst_20 = arith.constant 1.000000e+00 : f32
    %24 = vector.broadcast %cst_20 : f32 to vector<1x256xf32>
    %25 = arith.addf %24, %23 : vector<1x256xf32>
    %26 = arith.divf %24, %25 : vector<1x256xf32>
    %c0_21 = arith.constant 0 : index
    %c0_22 = arith.constant 0 : index
    %c0_23 = arith.constant 0 : index
    %27 = vector.load %arg3[%c0_21, %c0_22, %c0_23] : memref<1x8x256xf32, #tpu.memory_space<vmem>>, vector<1x8x256xf32>
    %28 = vector.shape_cast %27 : vector<1x8x256xf32> to vector<8x256xf32>
    %29 = vector.broadcast %26 : vector<1x256xf32> to vector<8x256xf32>
    %30 = arith.mulf %28, %29 : vector<8x256xf32>
    %c0_24 = arith.constant 0 : index
    %c0_25 = arith.constant 0 : index
    %c0_26 = arith.constant 0 : index
    %31 = vector.load %arg8[%c0_24, %c0_25, %c0_26] : memref<1x8x256xf32, #tpu.memory_space<vmem>>, vector<1x8x256xf32>
    %32 = vector.shape_cast %31 : vector<1x8x256xf32> to vector<8x256xf32>
    %33 = vector.shape_cast %30 : vector<8x256xf32> to vector<1x8x256xf32>
    tpu.vector_store %arg8[%c0_24, %c0_25, %c0_26], %33 {strides = array<i32>} : memref<1x8x256xf32, #tpu.memory_space<vmem>>, vector<1x8x256xf32>,
    return
  }
  func.func @transform_0(%arg0: i32, %arg1: i32) -> (i32, i32, i32) {
    %c0_i32 = arith.constant 0 : i32
    %c0_i32_0 = arith.constant 0 : i32
    return %arg0, %c0_i32, %arg1 : i32, i32, i32
  }
  func.func @transform_1(%arg0: i32, %arg1: i32) -> (i32, i32, i32) {
    %c0_i32 = arith.constant 0 : i32
    %c0_i32_0 = arith.constant 0 : i32
    return %arg0, %c0_i32, %arg1 : i32, i32, i32
  }
  func.func @transform_2(%arg0: i32, %arg1: i32) -> (i32, i32) {
    %c0_i32 = arith.constant 0 : i32
    %c0_i32_0 = arith.constant 0 : i32
    %c0_i32_1 = arith.constant 0 : i32
    return %c0_i32, %c0_i32_0 : i32, i32
  }
  func.func @transform_3(%arg0: i32, %arg1: i32) -> (i32, i32) {
    %c0_i32 = arith.constant 0 : i32
    %c0_i32_0 = arith.constant 0 : i32
    %c0_i32_1 = arith.constant 0 : i32
    return %c0_i32, %c0_i32_0 : i32, i32
  }
  func.func @transform_4(%arg0: i32, %arg1: i32) -> (i32, i32) {
    %c0_i32 = arith.constant 0 : i32
    %c0_i32_0 = arith.constant 0 : i32
    %c0_i32_1 = arith.constant 0 : i32
    return %c0_i32, %c0_i32_0 : i32, i32
  }
  func.func @transform_5(%arg0: i32, %arg1: i32) -> (i32, i32) {
    %c0_i32 = arith.constant 0 : i32
    %c0_i32_0 = arith.constant 0 : i32
    %c0_i32_1 = arith.constant 0 : i32
    return %c0_i32, %c0_i32_0 : i32, i32
  }
  func.func @transform_6(%arg0: i32, %arg1: i32) -> (i32, i32, i32) {
    %c0_i32 = arith.constant 0 : i32
    %c0_i32_0 = arith.constant 0 : i32
    return %arg0, %c0_i32, %arg1 : i32, i32, i32
  }
}

</mosaic_0001>

<bundles_post_ra>
// kernel: tpu_custom_call.1
= control target key start
LH: loop header
LB: loop body
LE: loop exit
PB: predicated region body
PF: predicated region fallthrough
CT: control target
= control target key end

     0   :  { %s1045_s0 = inlined_call_operand.hbm [shape: f32[2,8,256], index: 0, kind: input, shape index: {}]   ;;  %s1046_s1 = inlined_call_operand.hbm [shape: f32[2,8,256], index: 1, kind: input, shape index: {}]   ;;  %s1047_s2 = inlined_call_operand.vmem [shape: f32[8,16], index: 2, kind: input, shape index: {}]   ;;  %s1048_s3 = inlined_call_operand.vmem [shape: f32[8,1], index: 3, kind: input, shape index: {}]   ;;  %s1049_s4 = inlined_call_operand.vmem [shape: f32[8,1], index: 4, kind: input, shape index: {}]   ;;  %s1050_s5 = inlined_call_operand.<no memory space> [shape: f32[1,1], index: 5, kind: input, shape index: {}]   ;;  %s1051_s6 = inlined_call_operand.hbm [shape: f32[2,8,256], index: 6, kind: output, shape index: {}]  }
   0x1   :  { %v11_v0 = vstv %s1050_s5 }
   0x2   :  { %12 = vst [vmem:[#allocation3] sm:$0x1] %v11_v0 }
   0x3   :  { %13 = vsyncpa [#allocation5], 0 }
   0x4   :  { %15 = vsyncpa [#allocation5 + $0x1], 0 }
   0x5   :  { %16 = vsyncpa [#allocation8], 0 }
   0x6   :  { %18 = vsyncpa [#allocation8 + $0x1], 0 }
   0x7   :  { %19 = vsyncpa [#allocation6], 0 }
   0x8   :  { %21 = vsyncpa [#allocation6 + $0x1], 0  ;;  %s895_s23 = smov 0   ;;  %s897_s24 = smov 0  }
   0x9   :  { %s899_s25 = smov 0   ;;  %s901_s26 = smov 0  }
   0xa   :  { %s903_s27 = smov 0   ;;  %s905_s28 = smov 0  }
   0xb LB: > { %1054 = sst [smem:[#allocation13_spill]] %s850_s27  ;;  %s604_s5 = sadd.s32 4294967295, %s854_s28   ;;  %s854_s28 = sphi %s905_s28, %s27_s28   ;;  %s850_s27 = sphi %s903_s27, %s1061_s27   ;;  %s846_s26 = sphi %s901_s26, %s1060_s26   ;;  %s842_s25 = sphi %s899_s25, %s1064_s25   ;;  %s838_s24 = sphi %s897_s24, %s1063_s24   ;;  %s834_s23 = sphi %s895_s23, %s1062_s23  }
   0xc   : > { %s605_s29 = sadd.s32 4294967294, %s854_s28   ;;  %s39_s30 = sadd.s32 1, %s850_s27 }
   0xd   : > { %s48_s7 = sadd.s32 1, %s842_s25  ;;  %p41_p0 = scmp.ge.s32.totalorder %s39_s30, 2 }
   0xe   : > { %p55_p1 = scmp.ne.s32.totalorder %s842_s25, %s838_s24  ;;  %p56_p2 = scmp.eq.s32.totalorder %s854_s28, 0 }
   0xf   : > { %p61_p3 = scmp.ne.s32.totalorder %s838_s24, %s834_s23  ;;  %s1066_s30 = smov (%p41_p0, %s39_s30), 0 }
  0x10   : > { %1055 = sst [smem:[#allocation14_spill]] %s1066_s30  ;;  %p936_p4 = por %p56_p2, %p55_p1 }
  0x11   : > { %p62_p5 = scmp.eq.s32.totalorder %s604_s5, 0  ;;  %s43_s9 = ssub.s32 %s850_s27, %s1066_s30 }
  0x12   : > { %p199_p6 = scmp.eq.s32.totalorder %s604_s5, 1  ;;  %p46_p7 = scmp.eq.s32.totalorder %s43_s9, 0 }
  0x13   : > { %p942_p8 = por %p62_p5, %p61_p3  ;;  %p205_p10 = scmp.eq.s32.totalorder %s605_s29, 1 }
  0x14   : > { %p946_p9 = por %p199_p6, %p55_p1  ;;  %p607_p12 = scmp.ge.s32.totalorder %s854_s28, 2 }
  0x15   : > { %s951_s12 = scalar_select %p46_p7, %s842_s25, %s48_s7  }
  0x16   : > { %p953_p11 = por %p205_p10, %p61_p3  ;;  %p647_p13 = scmp.lt.s32.totalorder %s854_s28, 2 }
  0x17   : > { %s237_s14 = sand.u32 1, %s842_s25   ;;  %s627_s16 = sshll.u32 %s850_s27, 4 }
  0x18   : > { %s608_s15 = sshll.u32 %s237_s14, 4  ;;  %s248_s19 = scalar_lea.hbm %s1045_s0, %s627_s16 }
  0x19   : > { %s241_s20 = scalar_lea.vmem [#allocation4], %s608_s15  ;;  %s250_s22 = sshll.u32 %s248_s19, 4  ;;  %s251_s22 = int_to_ptr.hbm [resolvable:$true] %s250_s22 }
  0x1a   : > { %s252_s21 = sshll.u32 %s241_s20, 4  ;;  %p637_p0 = pnand %p647_p13, %p936_p4  ;;  %s253_s21 = int_to_ptr.vmem [resolvable:$true] %s252_s21 }
  0x1b   : > { %p614_p1 = scmp.ge.s32.totalorder %s854_s28, 1  ;;  %p279_p2 = scmp.lt.s32.totalorder %s854_s28, 3 }
  0x1c   : > { %s238_s5 = scalar_lea.sflag [#allocation5], %s237_s14  ;;  %s270_s9 = scalar_lea.hbm %s1046_s1, %s627_s16 }
  0x1d   : > { %639 = dma.hbm_to_vmem [thread:$0]  (!%p637_p0), %s251_s22, 256, %s253_s21, %s238_s5  }
  0x1e   : > { %p280_p3 = pnand %p614_p1, %p279_p2  ;;  %s263_s30 = scalar_lea.vmem [#allocation7], %s608_s15 }
  0x1f   : > { %s274_s27 = sshll.u32 %s263_s30, 4  ;;  %s272_s17 = sshll.u32 %s270_s9, 4  ;;  %s275_s27 = int_to_ptr.vmem [resolvable:$true] %s274_s27  ;;  %s273_s17 = int_to_ptr.hbm [resolvable:$true] %s272_s17 }
  0x20   : > { %s260_s18 = scalar_lea.sflag [#allocation8], %s237_s14  ;;  %283 = sbr.rel (%p280_p3) target bundleno = 225 (0xe1), region = 44 }
  0x21   : > { %642 = dma.hbm_to_vmem [thread:$0]  (!%p637_p0), %s273_s17, 256, %s275_s27, %s260_s18  }
  0x22   : > { %s972_s8 = sand.u32 (!%p280_p3), 1, %s838_s24  }
  0x23   : > { %s975_s19 = sshll.u32 (!%p280_p3), %s972_s8, 4  ;;  %s286_s20 = scalar_lea.sflag (!%p280_p3), [#allocation5], %s972_s8 }
  0x24   : > { %s289_s21 = scalar_lea.vmem (!%p280_p3), [#allocation4], %s975_s19 }
  0x25   : > { %821 = dma.done.wait (%p942_p8), %s286_s20, 256  }
  0x26   : > { %823 = vsyncadd (%p942_p8), %s286_s20, 4294967040  ;;  %s296_s27 = scalar_lea.sflag [#allocation8], %s972_s8  ;;  %s299_s30 = scalar_lea.vmem [#allocation7], %s975_s19 }
  0x27   : > { %825 = dma.done.wait (%p942_p8), %s296_s27, 256  }
  0x28   : > { %827 = vsyncadd (%p942_p8), %s296_s27, 4294967040  ;;  %v856_v1 = vmov 0   ;;  %v989_v2 = vld [vmem:[%s299_s30] sm:$0xff]  ;;  %v991_v3 = vld [vmem:[%s299_s30 + $0x8] sm:$0xff]  ;;  %vm356_vm0 = vcmask 130048   ;;  %s629_s29 = sshll.u32 %s846_s26, 4 }
  0x29   : > { %698 = vset.pattern.permute.xlu0 %v856_v1  ;;  %699 = vset.pattern.permute.xlu1 %v856_v1  ;;  %v350_v4 = vld [vmem:[%s1048_s3] sm:$0xff]  ;;  %s489_s17 = scalar_lea.hbm %s1051_s6, %s629_s29  ;;  %s333_s26 = scalar_lea.vmem [#allocation9], %s975_s19 }
  0x2a   : > { %374 = vmatpush.msra.mxu0 %v989_v2  ;;  %394 = vmatpush.msra.mxu1 %v991_v3  ;;  %v337_v5 = vld [vmem:[%s289_s21] sm:$0xff]  ;;  %v338_v6 = vld [vmem:[%s289_s21 + $0x8] sm:$0xff]  ;;  %s491_s18 = sshll.u32 %s333_s26, 4  ;;  %s493_s20 = sshll.u32 %s489_s17, 4  ;;  %s492_s18 = int_to_ptr.vmem [resolvable:$true] %s491_s18  ;;  %s494_s20 = int_to_ptr.hbm [resolvable:$true] %s493_s20 }
  0x2b   : > { %v345_v7 = vld [vmem:[%s1047_s2] sm:$0xff]  ;;  %353 = vperm.xlu0 %698, %v350_v4   ;;  %s476_s21 = scalar_lea.sflag [#allocation6], %s972_s8  ;;  %s782_s27 = sshra.s32 %s494_s20, 4  ;;  %s783_s27 = int_to_ptr.hbm [resolvable:$true] %s782_s27 }
  0x2c   : > { %v422_v8 = vld [vmem:[#allocation3] sm:$0x1]  ;;  %375 = vmatpush.msra.mxu0 %v337_v5  ;;  %395 = vmatpush.msra.mxu1 %v338_v6  ;;  %s784_s30 = scalar_lea.hbm %s783_s27, 16  ;;  %s788_s15 = scalar_lea.hbm %s1051_s6, 32 }
  0x2d   : > { %618 = vmatmul.msk.f32.vlgmr.msra.gmra.mxu0 %vm356_vm0, %v345_v7  ;;  %619 = vmatmul.msk.f32.vlgmr.msra.gmra.mxu1 %vm356_vm0, %v345_v7  ;;  %v402_v9 = vld [vmem:[%s1049_s4] sm:$0xff]  ;;  %p785_p4 = scmp.ne.s32.totalorder %s783_s27, %s784_s30  ;;  %p789_p7 = scmp.lt.s32.totalorder %s783_s27, %s1051_s6 }
  0x2e   : > { %425 = vperm.xlu1 %699, %v422_v8   ;;  %p790_p8 = scmp.lt.s32.totalorder %s788_s15, %s784_s30 }
  0x2f   : > { %p786_p5 = pnand %p785_p4, %p946_p9 }
  0x30   : > { %p791_p10 = por %p790_p8, %p789_p7 }
  0x31   : > { %p787_p6 = pneg %p786_p5 }
  0x33   : > { %405 = vperm.xlu0 %698, %v402_v9   ;;  %p792_p13 = pnand %p791_p10, %p787_p6 }
  0x9d   : > { %v354_v10 = vpop.permute.xlu0 %353 }
  0xa0   : > { %v426_v26 = vpop.permute.xlu1 %425 }
  0xa1   : > { %v428_v31 = vperm.slane %v426_v26, 0 }
  0xa5   : > { %v406_v17 = vpop.permute.xlu0 %405 }
  0xaa   : > { %v377_v11 = vpop.f32.mrf.mxu0  ;;  %v397_v12 = vpop.f32.mrf.mxu1 }
  0xab   : > { %v378_v13 = vadd.f32 %v377_v11, %v354_v10  ;;  %v398_v14 = vadd.f32 %v397_v12, %v354_v10 }
  0xad   : > { %v400_v15 = vmax.f32 %v378_v13, 0.0  ;;  %v401_v16 = vmax.f32 %v398_v14, 0.0 }
  0xaf   : > { %v408_v18 = vmul.f32 %v406_v17, %v400_v15  ;;  %v409_v19 = vmul.f32 %v406_v17, %v401_v16 }
  0xb1   : > { %v410_v20 = vrot.slane %v408_v18, 4  ;;  %v416_v21 = vrot.slane %v409_v19, 4 }
  0xb3   : > { %v411_v22 = vadd.f32 %v410_v20, %v408_v18  ;;  %v417_v23 = vadd.f32 %v416_v21, %v409_v19 }
  0xb5   : > { %v412_v24 = vrot.slane %v411_v22, 2  ;;  %v418_v25 = vrot.slane %v417_v23, 2 }
  0xb7   : > { %v413_v27 = vadd.f32 %v412_v24, %v411_v22  ;;  %v419_v28 = vadd.f32 %v418_v25, %v417_v23 }
  0xb9   : > { %v414_v29 = vrot.slane %v413_v27, 1  ;;  %v420_v30 = vrot.slane %v419_v28, 1 }
  0xbb   : > { %v415_v32 = vadd.f32 %v414_v29, %v413_v27  ;;  %v421_v33 = vadd.f32 %v420_v30, %v419_v28 }
  0xbd   : > { %v429_v34 = vadd.f32 %v428_v31, %v415_v32  ;;  %v430_v35 = vadd.f32 %v428_v31, %v421_v33 }
  0xbf   : > { %v620_v36 = vmul.f32 -1.442695, %v429_v34  ;;  %v621_v37 = vmul.f32 -1.442695, %v430_v35 }
  0xc1   : > { %700 = vpow2.f32 %v620_v36 }
  0xc2   : > { %702 = vpow2.f32 %v621_v37 }
  0xc7   : > { %v701_v38 = vpop.eup %700 }
  0xc8   : > { %v703_v39 = vpop.eup %702  ;;  %v437_v40 = vadd.f32 1.0, %v701_v38 }
  0xc9   : > { %v438_v41 = vadd.f32 1.0, %v703_v39 }
  0xca   : > { %704 = vrcp.f32 %v437_v40  ;;  %v450_v47 = vand.u32 2147483648, %v437_v40  ;;  %v448_v51 = vand.u32 2147483647, %v437_v40  ;;  %vm444_vm3 = vweird.f32 %v437_v40 }
  0xcb   : > { %706 = vrcp.f32 %v438_v41  ;;  %v465_v50 = vand.u32 2147483648, %v438_v41  ;;  %v463_v53 = vand.u32 2147483647, %v438_v41  ;;  %vm459_vm5 = vweird.f32 %v438_v41 }
  0xcc   : > { %v451_v55 = vor.u32 1.1754944e-38, %v450_v47  ;;  %vm449_vm7 = vcmp.eq.f32.partialorder %v448_v51, 8.507059e+37 }
  0xcd   : > { %v466_v57 = vor.u32 1.1754944e-38, %v465_v50  ;;  %vm464_vm8 = vcmp.eq.f32.partialorder %v463_v53, 8.507059e+37 }
  0xd0   : > { %v705_v42 = vpop.eup %704 }
  0xd1   : > { %v707_v43 = vpop.eup %706  ;;  %v440_v44 = vmul.f32 %v705_v42, %v437_v40  ;;  %vm445_vm1 = vweird.f32 %v705_v42 }
  0xd2   : > { %v455_v45 = vmul.f32 %v707_v43, %v438_v41  ;;  %vm460_vm2 = vweird.f32 %v707_v43  ;;  %vm446_vm4 = vmor %vm444_vm3, %vm445_vm1 }
  0xd3   : > { %v441_v46 = vsub.f32 1.0, %v440_v44  ;;  %vm461_vm6 = vmor %vm459_vm5, %vm460_vm2 }
  0xd4   : > { %v456_v48 = vsub.f32 1.0, %v455_v45 }
  0xd5   : > { %v442_v49 = vmul.f32 %v705_v42, %v441_v46 }
  0xd6   : > { %v457_v52 = vmul.f32 %v707_v43, %v456_v48 }
  0xd7   : > { %v443_v54 = vadd.f32 %v705_v42, %v442_v49 }
  0xd8   : > { %v458_v56 = vadd.f32 %v707_v43, %v457_v52 }
  0xd9   : > { %v447_v58 = vsel %vm446_vm4, %v705_v42, %v443_v54 }
  0xda   : > { %v452_v59 = vsel %vm449_vm7, %v451_v55, %v447_v58  ;;  %v462_v60 = vsel %vm461_vm6, %v707_v43, %v458_v56 }
  0xdb   : > { %v467_v61 = vsel %vm464_vm8, %v466_v57, %v462_v60  ;;  %v471_v62 = vmul.f32 %v452_v59, %v989_v2 }
  0xdc   : > { %v472_v63 = vmul.f32 %v467_v61, %v991_v3 }
  0xdd   : > { %473 = vst [vmem:[%s333_s26] sm:$0xff] %v471_v62 }
  0xde   : > { %474 = vst [vmem:[%s333_s26 + $0x8] sm:$0xff] %v472_v63 }
  0xdf   : > { %795 = shalt.err (!%p792_p13)
}
  0xe0   : > { %634 = dma.vmem_to_hbm [thread:$0]  (%p946_p9), %s492_s18, 256, %s494_s20, %s476_s21  }
  0xe1 PF: > { %s505_s8 = sand.u32 1, %s834_s23   ;;  %p644_p0 = pnand %p607_p12, %p953_p11 }
  0xe2   : > { %s506_s22 = scalar_lea.sflag [#allocation6], %s505_s8 }
  0xe3   : > { %p645_p1 = pneg %p644_p0 }
  0xe5   : > { %829 = dma.done.wait (%p645_p1), %s506_s22, 256  }
  0xe6   : > { %831 = vsyncadd (%p645_p1), %s506_s22, 4294967040  ;;  %s27_s28 = sadd.s32 1, %s854_s28   ;;  %s1060_s26 = sld [smem:[#allocation13_spill]] }
  0xe7   : > { %p24_p2 = scmp.ge.s32.totalorder %s27_s28, 4   ;;  %s1061_s27 = sld [smem:[#allocation14_spill]] }
  0xe8   : > { %s1062_s23 = smov %s838_s24  ;;  %s1063_s24 = smov %s842_s25 }
  0xe9   : > { %s1064_s25 = smov %s951_s12  ;;  %26 = sbr.rel (!%p24_p2) target bundleno = 11 (0xb), region = 102 }
  0xee   :  { %512 = vsyncpa [#allocation5], 1 }
  0xef   :  { %514 = vsyncpa [#allocation5 + $0x1], 1 }
  0xf0   :  { %515 = vsyncpa [#allocation8], 1 }
  0xf1   :  { %517 = vsyncpa [#allocation8 + $0x1], 1 }
  0xf2   :  { %518 = vsyncpa [#allocation6], 1 }
  0xf3   :  { %520 = vsyncpa [#allocation6 + $0x1], 1 }

</bundles_post_ra>
